<compile_context>
chip_gen: v6e
topology: v6e:2x2x1
jax: 0.10.0
libtpu: 0.0.40
codegen_flags: <defaults>
</compile_context>

<pallas_src>
import jax
import jax.numpy as jnp
from jax.experimental import pallas as pl
from jax.experimental.pallas import tpu as pltpu


def actor_critic_kernel(x_ref, w_ref, b_ref, out_ref):
    x = x_ref[...]                                           # (B, 4)
    B = x.shape[0]

    # F.normalize(x, p=2, dim=0, eps=1e-12): per-feature L2 norm over batch.
    norm = jnp.sqrt(jnp.sum(x * x, axis=0, keepdims=True))   # (1, 4)
    inv = pl.reciprocal(jnp.maximum(norm, 1e-12), approx=False)
    xn = x * inv                                             # (B, 4)

    # l1: K=4 contraction as 4 broadcast multiply-adds on the VPU.
    w1 = w_ref[0]                                            # (128, 128); rows 0..3 live
    b1 = b_ref[0:1, :]                                       # (1, 128)
    y = (xn[:, 0:1] * w1[0:1, :] + xn[:, 1:2] * w1[1:2, :]
         + xn[:, 2:3] * w1[2:3, :] + xn[:, 3:4] * w1[3:4, :] + b1)
    y = jnp.maximum(y, 0.0)                                  # (B, 128); lanes 25: are 0

    # l2 (MXU, padded 128x128).
    y = jnp.dot(y, w_ref[1], preferred_element_type=jnp.float32) + b_ref[1:2, :]
    y = jnp.maximum(y, 0.0)                                  # (B, 128); lanes 50: are 0

    # actor = log_softmax(actor_lin1(y), dim=0)  -- over the batch axis.
    za = jnp.dot(y, w_ref[2], preferred_element_type=jnp.float32) + b_ref[2:3, :]
    zmax = jnp.max(za, axis=0, keepdims=True)
    zs = za - zmax
    lse = jnp.log(jnp.sum(jnp.exp(zs), axis=0, keepdims=True))
    actor = zs - lse                                         # lanes 0:2 valid

    # c = relu(l3(y.detach())); critic = tanh(critic_lin1(c)).
    # detach is a no-op for forward values; critic column is packed at lane 2.
    c = jnp.dot(y, w_ref[3], preferred_element_type=jnp.float32) + b_ref[3:4, :]
    c = jnp.maximum(c, 0.0)                                  # (B, 128); lanes 25: are 0
    critic = jnp.tanh(
        jnp.dot(c, w_ref[4], preferred_element_type=jnp.float32) + b_ref[4:5, :]
    )                                                        # lane 2 valid, others tanh(0)=0

    # Single lane-dense store: lanes 0:2 <- actor, lane 2 <- critic, rest 0.
    lane = jax.lax.broadcasted_iota(jnp.int32, (B, 128), 1)
    out_ref[...] = jnp.where(lane < 2, actor, critic)


def init_params(key):
    """PyTorch-style init U(-1/sqrt(fan_in), 1/sqrt(fan_in)).
    Weights stored as (in_features, out_features); biases as (1, out_features)."""
    dims = [("l1", 4, 25), ("l2", 25, 50), ("actor_lin1", 50, 2),
            ("l3", 50, 25), ("critic_lin1", 25, 1)]
    params = {}
    for name, fan_in, fan_out in dims:
        key, kw, kb = jax.random.split(key, 3)
        bound = 1.0 / jnp.sqrt(jnp.float32(fan_in))
        params[name + "_w"] = jax.random.uniform(
            kw, (fan_in, fan_out), jnp.float32, -bound, bound)
        params[name + "_b"] = jax.random.uniform(
            kb, (1, fan_out), jnp.float32, -bound, bound)
    return params


def pack_params(params):
    """Zero-pad all weights into one (5,128,128) slab and biases into one
    (8,128) slab (done once, outside the hot path).  critic_lin1 column and
    bias are placed at lane index 2 so the kernel output is lane-dense."""
    w = jnp.zeros((5, 128, 128), jnp.float32)
    w = w.at[0, :4, :25].set(params["l1_w"])
    w = w.at[1, :25, :50].set(params["l2_w"])
    w = w.at[2, :50, :2].set(params["actor_lin1_w"])
    w = w.at[3, :50, :25].set(params["l3_w"])
    w = w.at[4, :25, 2:3].set(params["critic_lin1_w"])       # critic col -> lane 2

    b = jnp.zeros((8, 128), jnp.float32)
    b = b.at[0, :25].set(params["l1_b"][0])
    b = b.at[1, :50].set(params["l2_b"][0])
    b = b.at[2, :2].set(params["actor_lin1_b"][0])
    b = b.at[3, :25].set(params["l3_b"][0])
    b = b.at[4, 2:3].set(params["critic_lin1_b"][0])         # critic bias -> lane 2
    return w, b


def actor_critic_forward(x, w_slab, b_slab):
    B = x.shape[0]
    vmem = pl.BlockSpec(memory_space=pltpu.MemorySpace.VMEM)
    out = pl.pallas_call(
        actor_critic_kernel,
        out_shape=jax.ShapeDtypeStruct((B, 128), jnp.float32),
        in_specs=[vmem, vmem, vmem],
        out_specs=vmem,
    )(x, w_slab, b_slab)
    # Lane-dense packed output: actor in lanes 0:2, critic in lane 2.
    return out[:, 0:2], out[:, 2:3]


def actor_critic_reference(x, params):
    """Pure-JAX reference mirroring the PyTorch forward, for validation."""
    norm = jnp.sqrt(jnp.sum(x * x, axis=0, keepdims=True))
    xn = x / jnp.maximum(norm, 1e-12)
    y = jax.nn.relu(xn @ params["l1_w"] + params["l1_b"])
    y = jax.nn.relu(y @ params["l2_w"] + params["l2_b"])
    actor = jax.nn.log_softmax(y @ params["actor_lin1_w"] + params["actor_lin1_b"], axis=0)
    c = jax.nn.relu(y @ params["l3_w"] + params["l3_b"])
    critic = jnp.tanh(c @ params["critic_lin1_w"] + params["critic_lin1_b"])
    return actor, critic


if __name__ == "__main__":
    key = jax.random.PRNGKey(0)
    key, kx, kp = jax.random.split(key, 3)

    B = 2  # small batch; input state dim is 4 (e.g. CartPole observation)
    x = jax.random.normal(kx, (B, 4), jnp.float32)
    params = init_params(kp)
    w_slab, b_slab = pack_params(params)   # packed once; reused every call

    actor, critic = actor_critic_forward(x, w_slab, b_slab)
    actor, critic = jax.block_until_ready((actor, critic))

    ref_actor, ref_critic = actor_critic_reference(x, params)
    assert actor.shape == (B, 2) and critic.shape == (B, 1)
    assert jnp.allclose(actor, ref_actor, atol=1e-5, rtol=1e-5)
    assert jnp.allclose(critic, ref_critic, atol=1e-5, rtol=1e-5)

    print("KERNEL_OK")
</pallas_src>

<mosaic_0001>
module attributes {stable_mosaic.version = 11 : i64} {
  func.func @actor_critic_kernel(%arg0: memref<2x4xf32, #tpu.memory_space<vmem>>, %arg1: memref<5x128x128xf32, #tpu.memory_space<vmem>>, %arg2: memref<8x128xf32, #tpu.memory_space<vmem>>, %arg3: memref<2x128xf32, #tpu.memory_space<vmem>>) attributes {dimension_semantics = [], scalar_prefetch = 0 : i64, scratch_operands = 0 : i64, tpu.core_type = #tpu.core_type<tc>} {
    %c0 = arith.constant 0 : index
    %c0_0 = arith.constant 0 : index
    %0 = vector.load %arg0[%c0, %c0_0] : memref<2x4xf32, #tpu.memory_space<vmem>>, vector<2x4xf32>
    %1 = arith.mulf %0, %0 : vector<2x4xf32>
    %cst = arith.constant dense<0.000000e+00> : vector<4xf32>
    %2 = vector.multi_reduction <add>, %1, %cst [0] : vector<2x4xf32> to vector<4xf32>
    %3 = vector.shape_cast %2 : vector<4xf32> to vector<1x4xf32>
    %4 = math.sqrt %3 : vector<1x4xf32>
    %cst_1 = arith.constant 9.99999996E-13 : f32
    %5 = vector.broadcast %cst_1 : f32 to vector<1x4xf32>
    %6 = arith.maximumf %4, %5 : vector<1x4xf32>
    %7 = tpu.reciprocal %6 : vector<1x4xf32> -> vector<1x4xf32>
    %8 = vector.broadcast %7 : vector<1x4xf32> to vector<2x4xf32>
    %9 = arith.mulf %0, %8 : vector<2x4xf32>
    %c0_2 = arith.constant 0 : index
    %c0_3 = arith.constant 0 : index
    %c0_4 = arith.constant 0 : index
    %10 = vector.load %arg1[%c0_2, %c0_3, %c0_4] : memref<5x128x128xf32, #tpu.memory_space<vmem>>, vector<1x128x128xf32>
    %11 = vector.shape_cast %10 : vector<1x128x128xf32> to vector<128x128xf32>
    %c0_5 = arith.constant 0 : index
    %c0_6 = arith.constant 0 : index
    %12 = vector.load %arg2[%c0_5, %c0_6] : memref<8x128xf32, #tpu.memory_space<vmem>>, vector<1x128xf32>
    %13 = vector.extract_strided_slice %9 {offsets = [0, 0], sizes = [2, 1], strides = [1, 1]} : vector<2x4xf32> to vector<2x1xf32>
    %14 = vector.extract_strided_slice %11 {offsets = [0, 0], sizes = [1, 128], strides = [1, 1]} : vector<128x128xf32> to vector<1x128xf32>
    %15 = vector.broadcast %13 : vector<2x1xf32> to vector<2x128xf32>
    %16 = vector.broadcast %14 : vector<1x128xf32> to vector<2x128xf32>
    %17 = arith.mulf %15, %16 : vector<2x128xf32>
    %18 = vector.extract_strided_slice %9 {offsets = [0, 1], sizes = [2, 1], strides = [1, 1]} : vector<2x4xf32> to vector<2x1xf32>
    %19 = vector.extract_strided_slice %11 {offsets = [1, 0], sizes = [1, 128], strides = [1, 1]} : vector<128x128xf32> to vector<1x128xf32>
    %20 = vector.broadcast %18 : vector<2x1xf32> to vector<2x128xf32>
    %21 = vector.broadcast %19 : vector<1x128xf32> to vector<2x128xf32>
    %22 = arith.mulf %20, %21 : vector<2x128xf32>
    %23 = arith.addf %17, %22 : vector<2x128xf32>
    %24 = vector.extract_strided_slice %9 {offsets = [0, 2], sizes = [2, 1], strides = [1, 1]} : vector<2x4xf32> to vector<2x1xf32>
    %25 = vector.extract_strided_slice %11 {offsets = [2, 0], sizes = [1, 128], strides = [1, 1]} : vector<128x128xf32> to vector<1x128xf32>
    %26 = vector.broadcast %24 : vector<2x1xf32> to vector<2x128xf32>
    %27 = vector.broadcast %25 : vector<1x128xf32> to vector<2x128xf32>
    %28 = arith.mulf %26, %27 : vector<2x128xf32>
    %29 = arith.addf %23, %28 : vector<2x128xf32>
    %30 = vector.extract_strided_slice %9 {offsets = [0, 3], sizes = [2, 1], strides = [1, 1]} : vector<2x4xf32> to vector<2x1xf32>
    %31 = vector.extract_strided_slice %11 {offsets = [3, 0], sizes = [1, 128], strides = [1, 1]} : vector<128x128xf32> to vector<1x128xf32>
    %32 = vector.broadcast %30 : vector<2x1xf32> to vector<2x128xf32>
    %33 = vector.broadcast %31 : vector<1x128xf32> to vector<2x128xf32>
    %34 = arith.mulf %32, %33 : vector<2x128xf32>
    %35 = arith.addf %29, %34 : vector<2x128xf32>
    %36 = vector.broadcast %12 : vector<1x128xf32> to vector<2x128xf32>
    %37 = arith.addf %35, %36 : vector<2x128xf32>
    %cst_7 = arith.constant 0.000000e+00 : f32
    %38 = vector.broadcast %cst_7 : f32 to vector<2x128xf32>
    %39 = arith.maximumf %37, %38 : vector<2x128xf32>
    %c1 = arith.constant 1 : index
    %c0_8 = arith.constant 0 : index
    %c0_9 = arith.constant 0 : index
    %40 = vector.load %arg1[%c1, %c0_8, %c0_9] : memref<5x128x128xf32, #tpu.memory_space<vmem>>, vector<1x128x128xf32>
    %41 = vector.shape_cast %40 : vector<1x128x128xf32> to vector<128x128xf32>
    %cst_10 = arith.constant dense<0.000000e+00> : vector<2x128xf32>
    %42 = tpu.matmul %39, %41, %cst_10 {dimension_numbers = #tpu.dot_dimension_numbers<[1], [0], [0], [1], [0, 0, 1, 1], [], []>} : vector<2x128xf32>, vector<128x128xf32>, vector<2x128xf32> -> vector<2x128xf32>
    %c1_11 = arith.constant 1 : index
    %c0_12 = arith.constant 0 : index
    %43 = vector.load %arg2[%c1_11, %c0_12] : memref<8x128xf32, #tpu.memory_space<vmem>>, vector<1x128xf32>
    %44 = vector.broadcast %43 : vector<1x128xf32> to vector<2x128xf32>
    %45 = arith.addf %42, %44 : vector<2x128xf32>
    %cst_13 = arith.constant 0.000000e+00 : f32
    %46 = vector.broadcast %cst_13 : f32 to vector<2x128xf32>
    %47 = arith.maximumf %45, %46 : vector<2x128xf32>
    %c2 = arith.constant 2 : index
    %c0_14 = arith.constant 0 : index
    %c0_15 = arith.constant 0 : index
    %48 = vector.load %arg1[%c2, %c0_14, %c0_15] : memref<5x128x128xf32, #tpu.memory_space<vmem>>, vector<1x128x128xf32>
    %49 = vector.shape_cast %48 : vector<1x128x128xf32> to vector<128x128xf32>
    %cst_16 = arith.constant dense<0.000000e+00> : vector<2x128xf32>
    %50 = tpu.matmul %47, %49, %cst_16 {dimension_numbers = #tpu.dot_dimension_numbers<[1], [0], [0], [1], [0, 0, 1, 1], [], []>} : vector<2x128xf32>, vector<128x128xf32>, vector<2x128xf32> -> vector<2x128xf32>
    %c2_17 = arith.constant 2 : index
    %c0_18 = arith.constant 0 : index
    %51 = vector.load %arg2[%c2_17, %c0_18] : memref<8x128xf32, #tpu.memory_space<vmem>>, vector<1x128xf32>
    %52 = vector.broadcast %51 : vector<1x128xf32> to vector<2x128xf32>
    %53 = arith.addf %50, %52 : vector<2x128xf32>
    %cst_19 = arith.constant dense<0xFF800000> : vector<128xf32>
    %54 = vector.multi_reduction <maximumf>, %53, %cst_19 [0] : vector<2x128xf32> to vector<128xf32>
    %55 = vector.shape_cast %54 : vector<128xf32> to vector<1x128xf32>
    %56 = vector.broadcast %55 : vector<1x128xf32> to vector<2x128xf32>
    %57 = arith.subf %53, %56 : vector<2x128xf32>
    %58 = math.exp %57 : vector<2x128xf32>
    %cst_20 = arith.constant dense<0.000000e+00> : vector<128xf32>
    %59 = vector.multi_reduction <add>, %58, %cst_20 [0] : vector<2x128xf32> to vector<128xf32>
    %60 = vector.shape_cast %59 : vector<128xf32> to vector<1x128xf32>
    %61 = math.log %60 : vector<1x128xf32>
    %62 = vector.broadcast %61 : vector<1x128xf32> to vector<2x128xf32>
    %63 = arith.subf %57, %62 : vector<2x128xf32>
    %c3 = arith.constant 3 : index
    %c0_21 = arith.constant 0 : index
    %c0_22 = arith.constant 0 : index
    %64 = vector.load %arg1[%c3, %c0_21, %c0_22] : memref<5x128x128xf32, #tpu.memory_space<vmem>>, vector<1x128x128xf32>
    %65 = vector.shape_cast %64 : vector<1x128x128xf32> to vector<128x128xf32>
    %cst_23 = arith.constant dense<0.000000e+00> : vector<2x128xf32>
    %66 = tpu.matmul %47, %65, %cst_23 {dimension_numbers = #tpu.dot_dimension_numbers<[1], [0], [0], [1], [0, 0, 1, 1], [], []>} : vector<2x128xf32>, vector<128x128xf32>, vector<2x128xf32> -> vector<2x128xf32>
    %c3_24 = arith.constant 3 : index
    %c0_25 = arith.constant 0 : index
    %67 = vector.load %arg2[%c3_24, %c0_25] : memref<8x128xf32, #tpu.memory_space<vmem>>, vector<1x128xf32>
    %68 = vector.broadcast %67 : vector<1x128xf32> to vector<2x128xf32>
    %69 = arith.addf %66, %68 : vector<2x128xf32>
    %cst_26 = arith.constant 0.000000e+00 : f32
    %70 = vector.broadcast %cst_26 : f32 to vector<2x128xf32>
    %71 = arith.maximumf %69, %70 : vector<2x128xf32>
    %c4 = arith.constant 4 : index
    %c0_27 = arith.constant 0 : index
    %c0_28 = arith.constant 0 : index
    %72 = vector.load %arg1[%c4, %c0_27, %c0_28] : memref<5x128x128xf32, #tpu.memory_space<vmem>>, vector<1x128x128xf32>
    %73 = vector.shape_cast %72 : vector<1x128x128xf32> to vector<128x128xf32>
    %cst_29 = arith.constant dense<0.000000e+00> : vector<2x128xf32>
    %74 = tpu.matmul %71, %73, %cst_29 {dimension_numbers = #tpu.dot_dimension_numbers<[1], [0], [0], [1], [0, 0, 1, 1], [], []>} : vector<2x128xf32>, vector<128x128xf32>, vector<2x128xf32> -> vector<2x128xf32>
    %c4_30 = arith.constant 4 : index
    %c0_31 = arith.constant 0 : index
    %75 = vector.load %arg2[%c4_30, %c0_31] : memref<8x128xf32, #tpu.memory_space<vmem>>, vector<1x128xf32>
    %76 = vector.broadcast %75 : vector<1x128xf32> to vector<2x128xf32>
    %77 = arith.addf %74, %76 : vector<2x128xf32>
    %78 = math.tanh %77 : vector<2x128xf32>
    %79 = tpu.iota {dimensions = array<i32: 1>} : vector<2x128xi32>
    %c2_i32 = arith.constant 2 : i32
    %80 = vector.broadcast %c2_i32 : i32 to vector<2x128xi32>
    %81 = arith.cmpi slt, %79, %80 : vector<2x128xi32>
    %82 = arith.select %81, %63, %78 : vector<2x128xi1>, vector<2x128xf32>
    %c0_32 = arith.constant 0 : index
    %c0_33 = arith.constant 0 : index
    %83 = vector.load %arg3[%c0_32, %c0_33] : memref<2x128xf32, #tpu.memory_space<vmem>>, vector<2x128xf32>
    tpu.vector_store %arg3[%c0_32, %c0_33], %82 {strides = array<i32>} : memref<2x128xf32, #tpu.memory_space<vmem>>, vector<2x128xf32>,
    return
  }
}

</mosaic_0001>

<bundles_post_ra>
// kernel: tpu_custom_call.1
= control target key start
LH: loop header
LB: loop body
LE: loop exit
PB: predicated region body
PF: predicated region fallthrough
CT: control target
= control target key end

     0   :  { %8 = vsyncpa [#allocation3], 0  ;;  %s977_s0 = inlined_call_operand.hbm [shape: f32[2,4], index: 0, kind: input, shape index: {}]   ;;  %s978_s1 = inlined_call_operand.hbm [shape: f32[5,128,128], index: 1, kind: input, shape index: {}]   ;;  %s979_s2 = inlined_call_operand.hbm [shape: f32[8,128], index: 2, kind: input, shape index: {}]   ;;  %s980_s3 = inlined_call_operand.hbm [shape: f32[2,128], index: 3, kind: output, shape index: {}]  }
   0x1   :  { %9 = vsyncpa [#allocation6], 0 }
   0x2   :  { %10 = vsyncpa [#allocation4], 0  ;;  %s859_s12 = smov [#allocation5]  }
   0x3   :  { %s26_s13 = sshll.u32 %s859_s12, 4  ;;  %s27_s13 = int_to_ptr.vmem [resolvable:$true] %s26_s13 }
   0x4   :  { %s781_s14 = scalar_lea.vmem %s27_s13, 10240  ;;  %p786_p1 = scmp.lt.s32.totalorder %s27_s13, %s27_s13 }
   0x5   :  { %p782_p0 = scmp.ne.s32.totalorder %s27_s13, %s781_s14  ;;  %p787_p2 = scmp.lt.s32.totalorder %s781_s14, %s781_s14 }
   0x7   :  { %p788_p3 = por %p787_p2, %p786_p1 }
   0x9   :  { %p789_p4 = pnand %p788_p3, %p782_p0 }
   0xb   :  { %792 = shalt.err (!%p789_p4)
}
   0xc   :  { %s860_s15 = smov 128   ;;  %s861_s16 = smov 8  }
   0xd   :  { %32 = dma.hbm_to_vmem [thread:$0]  %s978_s1, 10240, %s27_s13, [#allocation6], %s860_s15, %s860_s15, %s861_s16  }
   0xe   :  { %s862_s19 = smov [#allocation2]   ;;  %s863_s21 = smov [#allocation7]  }
   0xf   :  { %s17_s20 = sshll.u32 %s862_s19, 4  ;;  %s39_s22 = sshll.u32 %s863_s21, 4  ;;  %s18_s20 = int_to_ptr.vmem [resolvable:$true] %s17_s20  ;;  %s40_s22 = int_to_ptr.vmem [resolvable:$true] %s39_s22 }
  0x10   :  { %s801_s23 = scalar_lea.vmem %s18_s20, 32  ;;  %p806_p6 = scmp.lt.s32.totalorder %s18_s20, %s18_s20 }
  0x11   :  { %p802_p5 = scmp.ne.s32.totalorder %s18_s20, %s801_s23  ;;  %p807_p7 = scmp.lt.s32.totalorder %s801_s23, %s801_s23 }
  0x13   :  { %p808_p8 = por %p807_p7, %p806_p6 }
  0x15   :  { %p809_p9 = pnand %p808_p8, %p802_p5 }
  0x17   :  { %812 = shalt.err (!%p809_p9)
}
  0x18   :  { %20 = dma.hbm_to_vmem [thread:$0]  %s977_s0, 32, %s18_s20, [#allocation3]  }
  0x19   :  { %s821_s26 = scalar_lea.vmem %s40_s22, 128  ;;  %p826_p11 = scmp.lt.s32.totalorder %s40_s22, %s40_s22 }
  0x1a   :  { %p822_p10 = scmp.ne.s32.totalorder %s40_s22, %s821_s26  ;;  %p827_p12 = scmp.lt.s32.totalorder %s821_s26, %s821_s26 }
  0x1c   :  { %p828_p13 = por %p827_p12, %p826_p11 }
  0x1e   :  { %p829_p0 = pnand %p828_p13, %p822_p10 }
  0x20   :  { %832 = shalt.err (!%p829_p0)
}
  0x21   :  { %42 = dma.hbm_to_vmem [thread:$0]  %s979_s2, 128, %s40_s22, [#allocation6]  }
  0x22   :  { %853 = dma.done.wait [#allocation3], 32  }
  0x23   :  { %854 = vsyncadd [#allocation3], 4294967264 }
  0x24   :  { %855 = dma.done.wait [#allocation6], 10368  }
  0x25   :  { %856 = vsyncadd [#allocation6], 4294956928  ;;  %v864_v0 = vmov 0   ;;  %v865_v1 = vmov 2   ;;  %v866_v2 = vmov 0.0   ;;  %vm54_vm0 = vcmask 25600  }
  0x26   :  { %758 = vset.pattern.permute.xlu0 %v864_v0  ;;  %760 = vset.pattern.permute.xlu1 %v865_v1  ;;  %v52_v3 = vld [vmem:[#allocation2] sm:$0x3]  ;;  %v135_v5 = vld [vmem:[#allocation5 + $0xf0] sm:$0xff]  ;;  %v134_v7 = vld [vmem:[#allocation5 + $0xe8] sm:$0xff]  ;;  %v867_v31 = vmov 1   ;;  %v868_v32 = vmov 3   ;;  %v79_v51 = vlaneseq }
  0x27   :  { %606 = vmatprep.subr.mxu0 %v866_v2  ;;  %641 = vmatprep.subr.mxu1 %v866_v2  ;;  %v136_v4 = vld [vmem:[#allocation5 + $0xf8] sm:$0xff]  ;;  %v53_v6 = vmul.f32 %v52_v3, %v52_v3  ;;  %v133_v10 = vld [vmem:[#allocation5 + $0xe0] sm:$0xff]  ;;  %v131_v14 = vld [vmem:[#allocation5 + $0xd0] sm:$0xff]  ;;  %vm869_vm3 = vmmov 0   ;;  %vm305_vm4 = vcmask 1041408   ;;  %s870_s0 = smov [#allocation8]  }
  0x28   :  { %607 = vmatpush3.msra.mxu0 %v136_v4  ;;  %v132_v12 = vld [vmem:[#allocation5 + $0xd8] sm:$0xff]  ;;  %v130_v16 = vld [vmem:[#allocation5 + $0xc8] sm:$0xff]  ;;  %v129_v25 = vld [vmem:[#allocation5 + $0xc0] sm:$0xff]  ;;  %638 = vmatprep.mubr.msk.f32.mxu0 %vm869_vm3, %v866_v2  ;;  %v80_v52 = vshrl.u32 %v79_v51, 7  ;;  %s523_s2 = sshll.u32 %s870_s0, 4  ;;  %s524_s2 = int_to_ptr.vmem [resolvable:$true] %s523_s2 }
  0x29   :  { %608 = vmatprep.subr.mxu0 %v866_v2  ;;  %v55_v8 = vsel %vm54_vm0, %v53_v6, 0.0  ;;  %v128_v26 = vld [vmem:[#allocation5 + $0xb8] sm:$0xff]  ;;  %v127_v29 = vld [vmem:[#allocation5 + $0xb0] sm:$0xff]  ;;  %v126_v30 = vld [vmem:[#allocation5 + $0xa8] sm:$0xff]  ;;  %673 = vmatprep.mubr.msk.f32.mxu1 %vm869_vm3, %v866_v2  ;;  %s833_s28 = scalar_lea.vmem %s524_s2, 32  ;;  %p838_p2 = scmp.lt.s32.totalorder %s524_s2, %s524_s2 }
  0x2a   :  { %609 = vmatpush3.msra.mxu0 %v135_v5  ;;  %v56_v9 = vrot.slane %v55_v8, 4  ;;  %v125_v33 = vld [vmem:[#allocation5 + $0xa0] sm:$0xff]  ;;  %v124_v34 = vld [vmem:[#allocation5 + $0x98] sm:$0xff]  ;;  %v123_v35 = vld [vmem:[#allocation5 + $0x90] sm:$0xff]  ;;  %v81_v53 = vsub.s32 0, %v80_v52  ;;  %v90_v54 = vsub.s32 1, %v80_v52  ;;  %p834_p1 = scmp.ne.s32.totalorder %s524_s2, %s833_s28  ;;  %p839_p3 = scmp.lt.s32.totalorder %s833_s28, %s833_s28 }
  0x2b   :  { %610 = vmatprep.subr.mxu0 %v866_v2  ;;  %v122_v36 = vld [vmem:[#allocation5 + $0x88] sm:$0xff]  ;;  %v121_v37 = vld [vmem:[#allocation5 + $0x80] sm:$0xff]  ;;  %v229_v38 = vld [vmem:[#allocation5 + $0x178] sm:$0xff]  ;;  %v100_v57 = vsub.s32 2, %v80_v52  ;;  %v110_v59 = vsub.s32 3, %v80_v52 }
  0x2c   :  { %611 = vmatpush3.msra.mxu0 %v134_v7  ;;  %v57_v11 = vadd.f32 %v56_v9, %v55_v8  ;;  %642 = vmatpush3.msra.mxu1 %v229_v38  ;;  %v228_v39 = vld [vmem:[#allocation5 + $0x170] sm:$0xff]  ;;  %v227_v40 = vld [vmem:[#allocation5 + $0x168] sm:$0xff]  ;;  %v226_v41 = vld [vmem:[#allocation5 + $0x160] sm:$0xff]  ;;  %p840_p4 = por %p839_p3, %p838_p2 }
  0x2d   :  { %612 = vmatprep.subr.mxu0 %v866_v2  ;;  %643 = vmatprep.subr.mxu1 %v866_v2  ;;  %v225_v42 = vld [vmem:[#allocation5 + $0x158] sm:$0xff]  ;;  %v224_v43 = vld [vmem:[#allocation5 + $0x150] sm:$0xff]  ;;  %v223_v44 = vld [vmem:[#allocation5 + $0x148] sm:$0xff] }
  0x2e   :  { %613 = vmatpush3.msra.mxu0 %v133_v10  ;;  %v58_v13 = vrot.slane %v57_v11, 2  ;;  %644 = vmatpush3.msra.mxu1 %v228_v39  ;;  %v222_v45 = vld [vmem:[#allocation5 + $0x140] sm:$0xff]  ;;  %v221_v46 = vld [vmem:[#allocation5 + $0x138] sm:$0xff]  ;;  %v220_v47 = vld [vmem:[#allocation5 + $0x130] sm:$0xff]  ;;  %p841_p5 = pnand %p840_p4, %p834_p1 }
  0x2f   :  { %614 = vmatprep.subr.mxu0 %v866_v2  ;;  %645 = vmatprep.subr.mxu1 %v866_v2  ;;  %v219_v48 = vld [vmem:[#allocation5 + $0x128] sm:$0xff]  ;;  %v218_v49 = vld [vmem:[#allocation5 + $0x120] sm:$0xff]  ;;  %v217_v50 = vld [vmem:[#allocation5 + $0x118] sm:$0xff] }
  0x30   :  { %615 = vmatpush3.msra.mxu0 %v132_v12  ;;  %v59_v15 = vadd.f32 %v58_v13, %v57_v11  ;;  %646 = vmatpush3.msra.mxu1 %v227_v40  ;;  %v72_v55 = vld [vmem:[#allocation5] sm:$0xff]  ;;  %v342_v13 = vld [vmem:[#allocation5 + $0x1f8] sm:$0xff]  ;;  %v434_v38 = vld [vmem:[#allocation5 + $0x270] sm:$0xff] }
  0x31   :  { %616 = vmatprep.subr.mxu0 %v866_v2  ;;  %647 = vmatprep.subr.mxu1 %v866_v2  ;;  %v82_v60 = vrot.slane %v72_v55, %v81_v53  ;;  %v91_v61 = vrot.slane %v72_v55, %v90_v54  ;;  %v101_v62 = vrot.slane %v72_v55, %v100_v57  ;;  %v533_v9 = vld [vmem:[#allocation7] ss:$0 sm:$0xff]  ;;  %v433_v39 = vld [vmem:[#allocation5 + $0x268] sm:$0xff]  ;;  %v536_v54 = vld [vmem:[#allocation7 + $0x3] ss:$0 sm:$0xff] }
  0x32   :  { %617 = vmatpush3.msra.mxu0 %v131_v14  ;;  %v60_v17 = vrot.slane %v59_v15, 1  ;;  %648 = vmatpush3.msra.mxu1 %v226_v41  ;;  %v111_v63 = vrot.slane %v72_v55, %v110_v59  ;;  %v341_v14 = vld [vmem:[#allocation5 + $0x1f0] sm:$0xff]  ;;  %v432_v40 = vld [vmem:[#allocation5 + $0x260] sm:$0xff]  ;;  %v431_v41 = vld [vmem:[#allocation5 + $0x258] sm:$0xff] }
  0x33   :  { %618 = vmatprep.subr.mxu0 %v866_v2  ;;  %649 = vmatprep.subr.mxu1 %v866_v2  ;;  %v421_v52 = vld [vmem:[#allocation5 + $0x208] sm:$0xff]  ;;  %v420_v53 = vld [vmem:[#allocation5 + $0x200] sm:$0xff] }
  0x34   :  { %619 = vmatpush3.msra.mxu0 %v130_v16  ;;  %v61_v18 = vadd.f32 %v60_v17, %v59_v15  ;;  %650 = vmatpush3.msra.mxu1 %v225_v42  ;;  %v340_v15 = vld [vmem:[#allocation5 + $0x1e8] sm:$0xff]  ;;  %v339_v16 = vld [vmem:[#allocation5 + $0x1e0] sm:$0xff]  ;;  %v338_v17 = vld [vmem:[#allocation5 + $0x1d8] sm:$0xff] }
  0x35   :  { %620 = vmatprep.subr.mxu0 %v866_v2  ;;  %651 = vmatprep.subr.mxu1 %v866_v2  ;;  %v430_v42 = vld [vmem:[#allocation5 + $0x250] sm:$0xff] }
  0x36   :  { %763 = vrsqrt.f32 %v61_v18  ;;  %vm64_vm1 = vcmp.eq.f32.partialorder %v61_v18, inf  ;;  %v67_v20 = vand.u32 2147483648, %v61_v18  ;;  %vm66_vm2 = vcmp.eq.f32.partialorder %v61_v18, 0.0  ;;  %621 = vmatpush3.msra.mxu0 %v129_v25  ;;  %652 = vmatpush3.msra.mxu1 %v224_v43  ;;  %v330_v25 = vld [vmem:[#allocation5 + $0x198] sm:$0xff]  ;;  %v429_v43 = vld [vmem:[#allocation5 + $0x248] sm:$0xff] }
  0x37   :  { %622 = vmatprep.subr.mxu0 %v866_v2  ;;  %653 = vmatprep.subr.mxu1 %v866_v2 }
  0x38   :  { %623 = vmatpush3.msra.mxu0 %v128_v26  ;;  %654 = vmatpush3.msra.mxu1 %v223_v44  ;;  %v216_v26 = vld [vmem:[#allocation5 + $0x110] sm:$0xff]  ;;  %v428_v44 = vld [vmem:[#allocation5 + $0x240] sm:$0xff] }
  0x39   :  { %624 = vmatprep.subr.mxu0 %v866_v2  ;;  %655 = vmatprep.subr.mxu1 %v866_v2 }
  0x3a   :  { %625 = vmatpush3.msra.mxu0 %v127_v29  ;;  %656 = vmatpush3.msra.mxu1 %v222_v45  ;;  %v328_v29 = vld [vmem:[#allocation5 + $0x188] sm:$0xff]  ;;  %v427_v45 = vld [vmem:[#allocation5 + $0x238] sm:$0xff] }
  0x3b   :  { %626 = vmatprep.subr.mxu0 %v866_v2  ;;  %657 = vmatprep.subr.mxu1 %v866_v2 }
  0x3c   :  { %627 = vmatpush3.msra.mxu0 %v126_v30  ;;  %658 = vmatpush3.msra.mxu1 %v221_v46  ;;  %v214_v30 = vld [vmem:[#allocation5 + $0x100] sm:$0xff]  ;;  %v426_v46 = vld [vmem:[#allocation5 + $0x230] sm:$0xff] }
  0x3d   :  { %628 = vmatprep.subr.mxu0 %v866_v2  ;;  %659 = vmatprep.subr.mxu1 %v866_v2 }
  0x3e   :  { %629 = vmatpush3.msra.mxu0 %v125_v33  ;;  %660 = vmatpush3.msra.mxu1 %v220_v47  ;;  %v425_v47 = vld [vmem:[#allocation5 + $0x228] sm:$0xff] }
  0x3f   :  { %630 = vmatprep.subr.mxu0 %v866_v2  ;;  %661 = vmatprep.subr.mxu1 %v866_v2 }
  0x40   :  { %631 = vmatpush3.msra.mxu0 %v124_v34  ;;  %662 = vmatpush3.msra.mxu1 %v219_v48  ;;  %v424_v48 = vld [vmem:[#allocation5 + $0x220] sm:$0xff] }
  0x41   :  { %632 = vmatprep.subr.mxu0 %v866_v2  ;;  %663 = vmatprep.subr.mxu1 %v866_v2 }
  0x42   :  { %633 = vmatpush3.msra.mxu0 %v123_v35  ;;  %664 = vmatpush3.msra.mxu1 %v218_v49  ;;  %v423_v49 = vld [vmem:[#allocation5 + $0x218] sm:$0xff] }
  0x43   :  { %v764_v19 = vpop.eup %763  ;;  %634 = vmatprep.subr.mxu0 %v866_v2  ;;  %665 = vmatprep.subr.mxu1 %v866_v2 }
  0x44   :  { %v63_v21 = vmul.f32 %v764_v19, %v61_v18  ;;  %635 = vmatpush3.msra.mxu0 %v122_v36  ;;  %666 = vmatpush3.msra.mxu1 %v217_v50  ;;  %v336_v19 = vld [vmem:[#allocation5 + $0x1c8] sm:$0xff]  ;;  %v422_v50 = vld [vmem:[#allocation5 + $0x210] sm:$0xff] }
  0x45   :  { %636 = vmatprep.subr.mxu0 %v866_v2  ;;  %667 = vmatprep.subr.mxu1 %v866_v2 }
  0x46   :  { %v65_v22 = vsel %vm64_vm1, %v61_v18, %v63_v21  ;;  %637 = vmatpush3.msra.mxu0 %v121_v37  ;;  %v337_v18 = vld [vmem:[#allocation5 + $0x1d0] sm:$0xff]  ;;  %v334_v21 = vld [vmem:[#allocation5 + $0x1b8] sm:$0xff]  ;;  %668 = vmatpush3.msra.mxu1 %v216_v26 }
  0x47   :  { %v68_v23 = vsel %vm66_vm2, %v67_v20, %v65_v22  ;;  %676 = vmatprep.subr.mxu0 %v866_v2  ;;  %v335_v20 = vld [vmem:[#allocation5 + $0x1c0] sm:$0xff]  ;;  %v333_v22 = vld [vmem:[#allocation5 + $0x1b0] sm:$0xff]  ;;  %669 = vmatprep.subr.mxu1 %v866_v2  ;;  %v435_v37 = vld [vmem:[#allocation5 + $0x278] sm:$0xff] }
  0x48   :  { %v69_v24 = vmax.f32 %v68_v23, 1e-12  ;;  %v332_v23 = vld [vmem:[#allocation5 + $0x1a8] sm:$0xff] }
  0x4a   :  { %765 = vrcp.f32 %v69_v24  ;;  %v331_v24 = vld [vmem:[#allocation5 + $0x1a0] sm:$0xff] }
  0x57   :  { %v766_v27 = vpop.eup %765 }
  0x58   :  { %v71_v28 = vmul.f32 %v766_v27, %v52_v3  ;;  %v329_v27 = vld [vmem:[#allocation5 + $0x190] sm:$0xff] }
  0x5a   :  { %76 = vperm.xlu0 %758, %v71_v28   ;;  %95 = vperm.xlu1 %760, %v71_v28  }
  0x5e   :  { %759 = vset.pattern.permute.xlu0 %v867_v31  ;;  %761 = vset.pattern.permute.xlu1 %v868_v32  ;;  %v327_v31 = vld [vmem:[#allocation5 + $0x180] sm:$0xff] }
  0x5f   :  { %85 = vperm.xlu0 %759, %v71_v28   ;;  %105 = vperm.xlu1 %761, %v71_v28   ;;  %v215_v28 = vld [vmem:[#allocation5 + $0x108] sm:$0xff] }
  0x60   :  { %670 = vmatpush3.msra.mxu1 %v215_v28 }
  0x61   :  { %671 = vmatprep.subr.mxu1 %v866_v2 }
  0x62   :  { %672 = vmatpush3.msra.mxu1 %v214_v30 }
  0x63   :  { %762 = vset.pattern.permute.xlu0 %v868_v32  ;;  %711 = vmatprep.subr.mxu1 %v866_v2  ;;  %v534_v32 = vld [vmem:[#allocation7 + $0x1] ss:$0 sm:$0xff] }
  0xd5   :  { %v77_v56 = vpop.permute.xlu0 %76  ;;  %v96_v58 = vpop.permute.xlu1 %95 }
  0xd6   :  { %v83_v3 = vmul.f32 %v82_v60, %v77_v56  ;;  %v102_v5 = vmul.f32 %v101_v62, %v96_v58 }
  0xda   :  { %v86_v0 = vpop.permute.xlu0 %85  ;;  %v106_v1 = vpop.permute.xlu1 %105 }
  0xdb   :  { %v92_v4 = vmul.f32 %v91_v61, %v86_v0  ;;  %v112_v7 = vmul.f32 %v111_v63, %v106_v1  ;;  %v535_v61 = vld [vmem:[#allocation7 + $0x2] ss:$0 sm:$0xff] }
  0xdd   :  { %v93_v6 = vadd.f32 %v92_v4, %v83_v3 }
  0xdf   :  { %v103_v8 = vadd.f32 %v102_v5, %v93_v6 }
  0xe1   :  { %v113_v10 = vadd.f32 %v112_v7, %v103_v8 }
  0xe3   :  { %v118_v11 = vadd.f32 %v533_v9, %v113_v10 }
  0xe5   :  { %v119_v12 = vmax.f32 %v118_v11, 0.0 }
  0xe7   :  { %639 = vmatmul.mubr.f32.vlgmr.msra.gmra.mxu0 %v119_v12 }
  0xe8   :  { %677 = vmatpush3.msra.mxu0 %v342_v13  ;;  %708 = vmatprep.mubr.msk.f32.mxu0 %vm869_vm3, %v866_v2 }
  0xe9   :  { %678 = vmatprep.subr.mxu0 %v866_v2 }
  0xea   :  { %679 = vmatpush3.msra.mxu0 %v341_v14 }
  0xeb   :  { %680 = vmatprep.subr.mxu0 %v866_v2 }
  0xec   :  { %681 = vmatpush3.msra.mxu0 %v340_v15 }
  0xed   :  { %682 = vmatprep.subr.mxu0 %v866_v2 }
  0xee   :  { %683 = vmatpush3.msra.mxu0 %v339_v16  ;;  %v537_v16 = vld [vmem:[#allocation7 + $0x4] ss:$0 sm:$0xff] }
  0xef   :  { %684 = vmatprep.subr.mxu0 %v866_v2 }
  0xf0   :  { %685 = vmatpush3.msra.mxu0 %v338_v17 }
  0xf1   :  { %686 = vmatprep.subr.mxu0 %v866_v2 }
  0xf2   :  { %687 = vmatpush3.msra.mxu0 %v337_v18 }
  0xf3   :  { %688 = vmatprep.subr.mxu0 %v866_v2 }
  0xf4   :  { %689 = vmatpush3.msra.mxu0 %v336_v19 }
  0xf5   :  { %690 = vmatprep.subr.mxu0 %v866_v2 }
  0xf6   :  { %691 = vmatpush3.msra.mxu0 %v335_v20 }
  0xf7   :  { %692 = vmatprep.subr.mxu0 %v866_v2 }
  0xf8   :  { %693 = vmatpush3.msra.mxu0 %v334_v21  ;;  %v513_v21 = vand.u32 127, %v79_v51 }
  0xf9   :  { %694 = vmatprep.subr.mxu0 %v866_v2 }
  0xfa   :  { %695 = vmatpush3.msra.mxu0 %v333_v22  ;;  %vm514_vm5 = vcmp.lt.s32.totalorder %v513_v21, 2 }
  0xfb   :  { %696 = vmatprep.subr.mxu0 %v866_v2 }
  0xfc   :  { %697 = vmatpush3.msra.mxu0 %v332_v23 }
  0xfd   :  { %698 = vmatprep.subr.mxu0 %v866_v2 }
  0xfe   :  { %699 = vmatpush3.msra.mxu0 %v331_v24 }
  0xff   :  { %700 = vmatprep.subr.mxu0 %v866_v2 }
 0x100   :  { %701 = vmatpush3.msra.mxu0 %v330_v25 }
 0x101   :  { %702 = vmatprep.subr.mxu0 %v866_v2 }
 0x102   :  { %703 = vmatpush3.msra.mxu0 %v329_v27 }
 0x103   :  { %704 = vmatprep.subr.mxu0 %v866_v2 }
 0x104   :  { %705 = vmatpush3.msra.mxu0 %v328_v29 }
 0x105   :  { %706 = vmatprep.subr.mxu0 %v866_v2 }
 0x106   :  { %707 = vmatpush3.msra.mxu0 %v327_v31 }
 0x1a7   :  { %v208_v33 = vpop.f32.mrf.mxu0 }
 0x1a8   :  { %v209_v34 = vadd.f32 %v534_v32, %v208_v33 }
 0x1a9   :  { %v640_v35 = vpop.f32.mrf.mxu0 }
 0x1aa   :  { %v212_v36 = vmax.f32 %v209_v34, 0.0 }
 0x1ac   :  { %674 = vmatmul.mubr.f32.vlgmr.msra.gmra.mxu1 %v212_v36  ;;  %709 = vmatmul.mubr.f32.vlgmr.msra.gmra.mxu0 %v212_v36 }
 0x1ad   :  { %712 = vmatpush3.msra.mxu1 %v435_v37  ;;  %743 = vmatprep.mubr.msk.f32.mxu1 %vm869_vm3, %v866_v2 }
 0x1ae   :  { %713 = vmatprep.subr.mxu1 %v866_v2 }
 0x1af   :  { %714 = vmatpush3.msra.mxu1 %v434_v38 }
 0x1b0   :  { %715 = vmatprep.subr.mxu1 %v866_v2 }
 0x1b1   :  { %716 = vmatpush3.msra.mxu1 %v433_v39 }
 0x1b2   :  { %717 = vmatprep.subr.mxu1 %v866_v2 }
 0x1b3   :  { %718 = vmatpush3.msra.mxu1 %v432_v40 }
 0x1b4   :  { %719 = vmatprep.subr.mxu1 %v866_v2 }
 0x1b5   :  { %720 = vmatpush3.msra.mxu1 %v431_v41 }
 0x1b6   :  { %721 = vmatprep.subr.mxu1 %v866_v2 }
 0x1b7   :  { %722 = vmatpush3.msra.mxu1 %v430_v42 }
 0x1b8   :  { %723 = vmatprep.subr.mxu1 %v866_v2 }
 0x1b9   :  { %724 = vmatpush3.msra.mxu1 %v429_v43 }
 0x1ba   :  { %725 = vmatprep.subr.mxu1 %v866_v2 }
 0x1bb   :  { %726 = vmatpush3.msra.mxu1 %v428_v44 }
 0x1bc   :  { %727 = vmatprep.subr.mxu1 %v866_v2 }
 0x1bd   :  { %728 = vmatpush3.msra.mxu1 %v427_v45 }
 0x1be   :  { %729 = vmatprep.subr.mxu1 %v866_v2 }
 0x1bf   :  { %730 = vmatpush3.msra.mxu1 %v426_v46 }
 0x1c0   :  { %731 = vmatprep.subr.mxu1 %v866_v2 }
 0x1c1   :  { %732 = vmatpush3.msra.mxu1 %v425_v47 }
 0x1c2   :  { %733 = vmatprep.subr.mxu1 %v866_v2 }
 0x1c3   :  { %734 = vmatpush3.msra.mxu1 %v424_v48 }
 0x1c4   :  { %735 = vmatprep.subr.mxu1 %v866_v2 }
 0x1c5   :  { %736 = vmatpush3.msra.mxu1 %v423_v49 }
 0x1c6   :  { %737 = vmatprep.subr.mxu1 %v866_v2 }
 0x1c7   :  { %738 = vmatpush3.msra.mxu1 %v422_v50 }
 0x1c8   :  { %739 = vmatprep.subr.mxu1 %v866_v2 }
 0x1c9   :  { %740 = vmatpush3.msra.mxu1 %v421_v52 }
 0x1ca   :  { %741 = vmatprep.subr.mxu1 %v866_v2 }
 0x1cb   :  { %742 = vmatpush3.msra.mxu1 %v420_v53 }
 0x26c   :  { %v301_v55 = vpop.f32.mrf.mxu1  ;;  %v414_v56 = vpop.f32.mrf.mxu0 }
 0x26d   :  { %v415_v57 = vadd.f32 %v536_v54, %v414_v56  ;;  %v302_v62 = vadd.f32 %v535_v61, %v301_v55 }
 0x26e   :  { %v675_v58 = vpop.f32.mrf.mxu1  ;;  %v710_v59 = vpop.f32.mrf.mxu0 }
 0x26f   :  { %v418_v60 = vmax.f32 %v415_v57, 0.0  ;;  %v306_v63 = vsel %vm305_vm4, %v302_v62, -inf }
 0x270   :  { %v307_v0 = vrot.slane %v306_v63, 4 }
 0x271   :  { %744 = vmatmul.mubr.f32.vlgmr.msra.gmra.mxu1 %v418_v60 }
 0x272   :  { %v308_v1 = vmax.f32 %v306_v63, %v307_v0 }
 0x274   :  { %v309_v3 = vrot.slane %v308_v1, 2 }
 0x276   :  { %v310_v4 = vmax.f32 %v308_v1, %v309_v3 }
 0x278   :  { %v311_v5 = vrot.slane %v310_v4, 1 }
 0x27a   :  { %v312_v2 = vmax.f32 %v310_v4, %v311_v5 }
 0x27c   :  { %v313_v6 = vsub.f32 %v302_v62, %v312_v2 }
 0x27e   :  { %v314_v7 = vmul.f32 1.442695, %v313_v6 }
 0x280   :  { %767 = vpow2.f32 %v314_v7 }
 0x28d   :  { %v768_v8 = vpop.eup %767 }
 0x28e   :  { %v316_v9 = vsel %vm305_vm4, %v768_v8, 0.0 }
 0x28f   :  { %v317_v10 = vrot.slane %v316_v9, 4 }
 0x291   :  { %v318_v11 = vadd.f32 %v317_v10, %v316_v9 }
 0x293   :  { %v319_v12 = vrot.slane %v318_v11, 2 }
 0x295   :  { %v320_v13 = vadd.f32 %v319_v12, %v318_v11 }
 0x297   :  { %v321_v14 = vrot.slane %v320_v13, 1 }
 0x299   :  { %v322_v15 = vadd.f32 %v321_v14, %v320_v13 }
 0x29b   :  { %769 = vlog2.f32 %v322_v15 }
 0x2a8   :  { %v770_v20 = vpop.eup %769 }
 0x2a9   :  { %v324_v22 = vmul.f32 0.6931472, %v770_v20 }
 0x2ab   :  { %v325_v23 = vsub.f32 %v313_v6, %v324_v22 }
 0x331   :  { %v507_v17 = vpop.f32.mrf.mxu1 }
 0x332   :  { %v508_v18 = vadd.f32 %v537_v16, %v507_v17 }
 0x333   :  { %v745_v19 = vpop.f32.mrf.mxu1 }
 0x334   :  { %771 = vtanh.f32 %v508_v18 }
 0x341   :  { %v772_v24 = vpop.eup %771 }
 0x342   :  { %v515_v25 = vsel %vm514_vm5, %v325_v23, %v772_v24 }
 0x343   :  { %516 = vst [vmem:[#allocation8] sm:$0x3] %v515_v25 }
 0x344   :  { %844 = shalt.err (!%p841_p5)
}
 0x345   :  { %526 = dma.vmem_to_hbm [thread:$0]  %s524_s2, 32, %s980_s3, [#allocation4]  }
 0x346   :  { %857 = dma.done.wait [#allocation4], 32  }
 0x347   :  { %858 = vsyncadd [#allocation4], 4294967264 }
 0x348   :  { %530 = vsyncpa [#allocation3], 1 }
 0x349   :  { %531 = vsyncpa [#allocation6], 1 }
 0x34a   :  { %532 = vsyncpa [#allocation4], 1 }

</bundles_post_ra>
